<compile_context>
chip_gen: v7x
topology: tpu7x:2x2x1
jax: 0.10.0
libtpu: 0.0.40
codegen_flags: <defaults>
</compile_context>

<pallas_src>
import jax
import jax.numpy as jnp
from jax.experimental import pallas as pl
from jax.experimental.pallas import tpu as pltpu

_LANE = 1024                       # slab width for the flattened path (multiple of 128)
_MAX_LANE_TILE = 2048              # max lane-dim tile (multiple of 128)
_TARGET_TILE_BYTES = 2 * 1024 * 1024   # ~2 MiB/buffer -> ~12 MiB pipelined (v5e-safe)


def _round_up(x: int, m: int) -> int:
    return -(-x // m) * m


def _round_down(x: int, m: int) -> int:
    return (x // m) * m


def _cr_fusion_kernel(hr_ref, rr_ref, out_ref):
    # Elementwise mean over the stacked pair: 0.5 * (HR + RR).
    # Native-dtype compute: bf16 uses the bf16 VALU on v6e/v7x; compute is
    # nowhere near binding, so this is safe on v5e as well.
    out_ref[...] = ((hr_ref[...] + rr_ref[...]) * 0.5).astype(out_ref.dtype)


def _choose_tiles(rows: int, cols: int, itemsize: int):
    """Pick a (tb, tn) block: lane-dense where possible, ~2 MiB per buffer,
    and >= 2 grid steps when it cheaply can (v7x megacore)."""
    # Lane (last) dim.
    if cols < 128:
        tn = cols                                     # full extent (odd small widths)
    elif cols % 128 == 0:
        tn = min(cols, _MAX_LANE_TILE)                # fully lane-dense stores
    else:
        tn = min(_round_down(cols, 128), _MAX_LANE_TILE)  # dense + one partial edge block

    # Row (second-to-last) dim.
    if rows < 8:
        tb = rows                                     # must equal the full dim
    else:
        rows_budget = max(8, _TARGET_TILE_BYTES // (tn * itemsize))
        tb = max(8, min(_round_down(rows_budget, 8), _round_down(rows, 8)))
        # Ensure >= 2 grid steps so both v7x TensorCores get work.
        if pl.cdiv(rows, tb) * pl.cdiv(cols, tn) < 2 and rows >= 16:
            tb = max(8, _round_up(pl.cdiv(rows, 2), 8))
    return tb, tn


def _pallas_mean2_2d(hr: jax.Array, rr: jax.Array) -> jax.Array:
    """Tiled elementwise mean of two equally shaped 2-D arrays."""
    rows, cols = hr.shape
    tb, tn = _choose_tiles(rows, cols, jnp.dtype(hr.dtype).itemsize)
    grid = (pl.cdiv(rows, tb), pl.cdiv(cols, tn))
    return pl.pallas_call(
        _cr_fusion_kernel,
        out_shape=jax.ShapeDtypeStruct((rows, cols), hr.dtype),
        grid=grid,
        in_specs=[
            pl.BlockSpec((tb, tn), lambda i, j: (i, j)),
            pl.BlockSpec((tb, tn), lambda i, j: (i, j)),
        ],
        out_specs=pl.BlockSpec((tb, tn), lambda i, j: (i, j)),
        compiler_params=pltpu.CompilerParams(
            dimension_semantics=("parallel", "parallel"),  # no reduction axis
        ),
    )(hr, rr)


def cr_fusion_module(
    hr_deep_features: jax.Array,
    rr_deep_features: jax.Array,
    *,
    force_pallas: bool = False,
    min_pallas_elements: int = 1 << 20,
) -> jax.Array:
    """Pallas implementation of CR_fusion_module.forward: (HR + RR) / 2.

    Args:
      hr_deep_features: (B, D) array.
      rr_deep_features: (B, D) array (same shape/dtype as HR).
      force_pallas: always take the Pallas path (used by tests).
      min_pallas_elements: below this element count, use plain JAX so XLA can
        fuse the average with producers/consumers (preferred in production).
    Returns:
      (B, D) array, mean of the two feature vectors per example.
    """
    assert hr_deep_features.shape == rr_deep_features.shape
    assert hr_deep_features.dtype == rr_deep_features.dtype
    assert hr_deep_features.ndim == 2, "expects (B, D) deep features"
    B, D = hr_deep_features.shape
    n = B * D

    if n < min_pallas_elements and not force_pallas:
        # Zero-arithmetic-intensity op: let XLA fuse it with its neighbors.
        return (hr_deep_features + rr_deep_features) * 0.5

    if D < 128 and n % _LANE == 0:
        # Narrow feature dim: flatten into a lane-dense slab.  This is a pure
        # reshape (no pad, no output slice).
        rows = n // _LANE
        out = _pallas_mean2_2d(
            hr_deep_features.reshape(rows, _LANE),
            rr_deep_features.reshape(rows, _LANE),
        )
        return out.reshape(B, D)

    # Common case: run directly on the (B, D) inputs.  No reshape/pad/slice;
    # stores are fully lane-dense whenever D is a multiple of 128, with at
    # most one masked edge block otherwise.
    return _pallas_mean2_2d(hr_deep_features, rr_deep_features)


if __name__ == "__main__":
    key = jax.random.PRNGKey(0)
    k1, k2, k3, k4, k5, k6, k7, k8 = jax.random.split(key, 8)

    def ref_mean(a, b):
        return jnp.mean(jnp.stack([a, b], axis=1), axis=1)

    # 1) Small shape consistent with (batch, hidden) deep features:
    #    direct path, full-extent block.
    B, D = 2, 32
    hr = jax.random.normal(k1, (B, D), jnp.float32)
    rr = jax.random.normal(k2, (B, D), jnp.float32)
    out = jax.block_until_ready(cr_fusion_module(hr, rr, force_pallas=True))
    assert out.shape == (B, D)
    assert jnp.allclose(out, ref_mean(hr, rr), atol=1e-6), "mismatch (small)"

    # 2) Lane-dense direct path (D % 128 == 0), >= 2 grid steps.
    B2, D2 = 16, 256
    hr2 = jax.random.normal(k3, (B2, D2), jnp.float32)
    rr2 = jax.random.normal(k4, (B2, D2), jnp.float32)
    out2 = jax.block_until_ready(cr_fusion_module(hr2, rr2, force_pallas=True))
    assert jnp.allclose(out2, ref_mean(hr2, rr2), atol=1e-6), "mismatch (lane-dense)"

    # 3) Slab path (D < 128, B*D multiple of 1024): pure reshape, no pad.
    B3, D3 = 16, 64
    hr3 = jax.random.normal(k5, (B3, D3), jnp.float32)
    rr3 = jax.random.normal(k6, (B3, D3), jnp.float32)
    out3 = jax.block_until_ready(cr_fusion_module(hr3, rr3, force_pallas=True))
    assert jnp.allclose(out3, ref_mean(hr3, rr3), atol=1e-6), "mismatch (slab)"

    # 4) Odd feature width (D % 128 != 0, D >= 128): partial lane edge block.
    B4, D4 = 8, 3000
    hr4 = jax.random.normal(k7, (B4, D4), jnp.float32)
    rr4 = jax.random.normal(k8, (B4, D4), jnp.float32)
    out4 = jax.block_until_ready(cr_fusion_module(hr4, rr4, force_pallas=True))
    assert jnp.allclose(out4, ref_mean(hr4, rr4), atol=1e-6), "mismatch (odd width)"

    print("KERNEL_OK")
</pallas_src>

<mosaic_0001>
module attributes {stable_mosaic.version = 11 : i64} {
  func.func @_cr_fusion_kernel(%arg0: i32, %arg1: i32, %arg2: memref<2x32xf32, #tpu.memory_space<vmem>>, %arg3: memref<2x32xf32, #tpu.memory_space<vmem>>, %arg4: memref<2x32xf32, #tpu.memory_space<vmem>>) attributes {dimension_semantics = [#tpu.dimension_semantics<parallel>, #tpu.dimension_semantics<parallel>], iteration_bounds = array<i64: 1, 1>, scalar_prefetch = 0 : i64, scratch_operands = 0 : i64, tpu.core_type = #tpu.core_type<tc>, window_params = [{transform_indices = @transform_0, window_bounds = array<i64: 2, 32>}, {transform_indices = @transform_1, window_bounds = array<i64: 2, 32>}, {transform_indices = @transform_2, window_bounds = array<i64: 2, 32>}]} {
    %c0 = arith.constant 0 : index
    %c0_0 = arith.constant 0 : index
    %0 = vector.load %arg2[%c0, %c0_0] : memref<2x32xf32, #tpu.memory_space<vmem>>, vector<2x32xf32>
    %c0_1 = arith.constant 0 : index
    %c0_2 = arith.constant 0 : index
    %1 = vector.load %arg3[%c0_1, %c0_2] : memref<2x32xf32, #tpu.memory_space<vmem>>, vector<2x32xf32>
    %2 = arith.addf %0, %1 : vector<2x32xf32>
    %cst = arith.constant 5.000000e-01 : f32
    %3 = vector.broadcast %cst : f32 to vector<2x32xf32>
    %4 = arith.mulf %2, %3 : vector<2x32xf32>
    %c0_3 = arith.constant 0 : index
    %c0_4 = arith.constant 0 : index
    %5 = vector.load %arg4[%c0_3, %c0_4] : memref<2x32xf32, #tpu.memory_space<vmem>>, vector<2x32xf32>
    tpu.vector_store %arg4[%c0_3, %c0_4], %4 {strides = array<i32>} : memref<2x32xf32, #tpu.memory_space<vmem>>, vector<2x32xf32>,
    return
  }
  func.func @transform_0(%arg0: i32, %arg1: i32) -> (i32, i32) {
    %c0_i32 = arith.constant 0 : i32
    return %arg0, %arg1 : i32, i32
  }
  func.func @transform_1(%arg0: i32, %arg1: i32) -> (i32, i32) {
    %c0_i32 = arith.constant 0 : i32
    return %arg0, %arg1 : i32, i32
  }
  func.func @transform_2(%arg0: i32, %arg1: i32) -> (i32, i32) {
    %c0_i32 = arith.constant 0 : i32
    return %arg0, %arg1 : i32, i32
  }
}

</mosaic_0001>

<bundles_post_ra>
// kernel: tpu_custom_call.1
= control target key start
LH: loop header
LB: loop body
LE: loop exit
PB: predicated region body
PF: predicated region fallthrough
CT: control target
= control target key end

     0   :  { %7 = vsyncpa [#allocation3], 0  ;;  %s139_s0 = inlined_call_operand.hbm [shape: f32[2,32], index: 0, kind: input, shape index: {}]   ;;  %s140_s1 = inlined_call_operand.vmem [shape: f32[2,32], index: 1, kind: input, shape index: {}]   ;;  %s141_s2 = inlined_call_operand.hbm [shape: f32[2,32], index: 2, kind: output, shape index: {}]  }
   0x1   :  { %8 = vsyncpa [#allocation4], 0  ;;  %s95_s9 = smov [#allocation2]   ;;  %s47_s13 = scalar_lea.hbm %s139_s0, 32 }
   0x2   :  { %s15_s10 = sshll.u32 %s95_s9, 4  ;;  %p48_p0 = scmp.ne.s32.totalorder %s139_s0, %s47_s13  ;;  %s16_s10 = int_to_ptr.vmem [resolvable:$true] %s15_s10 }
   0x3   :  { %p51_p1 = scmp.lt.u32.totalorder %s47_s13, %s139_s0 }
   0x5   :  { %p53_p2 = pnand %p51_p1, %p48_p0 }
   0x7   :  { %56 = shalt.err (!%p53_p2)
}
   0x8   :  { %s57_s18 = scalar_lea.vmem %s16_s10, 32  ;;  %p62_p4 = scmp.lt.s32.totalorder %s16_s10, %s16_s10 }
   0x9   :  { %p58_p3 = scmp.ne.s32.totalorder %s16_s10, %s57_s18  ;;  %p63_p5 = scmp.lt.s32.totalorder %s57_s18, %s57_s18 }
   0xb   :  { %p64_p6 = por %p63_p5, %p62_p4 }
   0xd   :  { %p65_p7 = pnand %p64_p6, %p58_p3 }
   0xf   :  { %68 = shalt.err (!%p65_p7)
}
  0x10   :  { %18 = dma.hbm_to_vmem [thread:$0]  %s139_s0, 32, %s16_s10, [#allocation3]  }
  0x11   :  { %91 = dma.done.wait [#allocation3], 32  }
  0x12   :  { %92 = vsyncadd [#allocation3], 4294967264  ;;  %v24_v0 = vld [vmem:[#allocation2] sm:$0x3]  ;;  %s96_s23 = smov [#allocation5]   ;;  %vm28_vm0 = vcmask 254976  }
  0x13   :  { %v25_v1 = vld [vmem:[%s140_s1] sm:$0x3]  ;;  %s36_s24 = sshll.u32 %s96_s23, 4  ;;  %s37_s24 = int_to_ptr.vmem [resolvable:$true] %s36_s24 }
  0x14   :  { %v26_v2 = vadd.f32 %v25_v1, %v24_v0  ;;  %s69_s25 = scalar_lea.vmem %s37_s24, 32  ;;  %p74_p9 = scmp.lt.s32.totalorder %s37_s24, %s37_s24 }
  0x15   :  { %p70_p8 = scmp.ne.s32.totalorder %s37_s24, %s69_s25  ;;  %p75_p10 = scmp.lt.s32.totalorder %s69_s25, %s69_s25 }
  0x16   :  { %v27_v3 = vmul.f32 0.5, %v26_v2 }
  0x17   :  { %p76_p11 = por %p75_p10, %p74_p9 }
  0x18   :  { %29 = vst.msk [vmem:[#allocation5] sm:$0x3] %vm28_vm0, %v27_v3 }
  0x19   :  { %p77_p12 = pnand %p76_p11, %p70_p8 }
  0x1b   :  { %80 = shalt.err (!%p77_p12)
}
  0x1c   :  { %s81_s27 = scalar_lea.hbm %s141_s2, 32 }
  0x1d   :  { %p82_p13 = scmp.ne.s32.totalorder %s141_s2, %s81_s27  ;;  %p85_p0 = scmp.lt.u32.totalorder %s81_s27, %s141_s2 }
  0x1f   :  { %p87_p1 = pnand %p85_p0, %p82_p13 }
  0x21   :  { %90 = shalt.err (!%p87_p1)
}
  0x22   :  { %39 = dma.vmem_to_hbm [thread:$0]  %s37_s24, 32, %s141_s2, [#allocation4]  }
  0x23   :  { %93 = dma.done.wait [#allocation4], 32  }
  0x24   :  { %94 = vsyncadd [#allocation4], 4294967264 }
  0x25   :  { %43 = vsyncpa [#allocation3], 1 }
  0x26   :  { %44 = vsyncpa [#allocation4], 1 }

</bundles_post_ra>
